<compile_context>
chip_gen: v7x
topology: tpu7x:2x2x1
jax: 0.10.0
libtpu: 0.0.40
codegen_flags: <defaults>
</compile_context>

<pallas_src>
import jax
import jax.numpy as jnp
from jax.experimental import pallas as pl
from jax.experimental.pallas import tpu as pltpu


def _round_up(x, m):
    return (x + m - 1) // m * m


def _actor_mlp_kernel(x_ref, w1_ref, b1_ref, w2_ref, b2_ref, w3_ref, b3_ref, o_ref):
    # x_ref: (tb, in) bf16; weights bf16; biases f32 (1, out); output f32.
    # Three fused MXU matmuls with f32 accumulation; relu/bias in f32 on the VPU.
    h1 = jnp.dot(x_ref[...], w1_ref[...], preferred_element_type=jnp.float32) + b1_ref[...]
    h1 = jnp.maximum(h1, 0.0).astype(jnp.bfloat16)

    h2 = jnp.dot(h1, w2_ref[...], preferred_element_type=jnp.float32) + b2_ref[...]
    h2 = jnp.maximum(h2, 0.0).astype(jnp.bfloat16)

    pi = jnp.dot(h2, w3_ref[...], preferred_element_type=jnp.float32) + b3_ref[...]
    o_ref[...] = pi.astype(o_ref.dtype)


def actor_forward(state, params, *, batch_tile=512):
    """state: (B, input_dims) float; params: dict from init_params. Returns (B, n_actions) f32."""
    w1, b1 = params["fc1"]
    w2, b2 = params["fc2"]
    w3, b3 = params["pi"]          # already zero-padded to a 128-wide lane dim
    n_actions = params["n_actions"]

    B, in_dims = state.shape
    fc1_dims = w1.shape[1]
    fc2_dims = w2.shape[1]
    n_pad = w3.shape[1]            # multiple of 128

    # Batch tile: multiple of 8 (sublane), capped at batch_tile rows. Pad the
    # batch so it divides evenly; padded rows are dead work, sliced off below.
    tb = min(_round_up(batch_tile, 8), _round_up(B, 8))
    Bp = _round_up(B, tb)

    x = state.astype(jnp.bfloat16)
    if Bp != B:
        x = jnp.pad(x, ((0, Bp - B), (0, 0)))

    grid = (Bp // tb,)

    # Weights/biases use a constant index_map -> same block every grid step, so
    # Pallas keeps them resident in VMEM (DMA'd once).
    resident = lambda a: pl.BlockSpec(a.shape, lambda i: (0,) * a.ndim)

    flops = 2 * Bp * (in_dims * fc1_dims + fc1_dims * fc2_dims + fc2_dims * n_pad)
    bytes_accessed = (
        (w1.size + w2.size + w3.size) * 2          # bf16 weights
        + (b1.size + b2.size + b3.size) * 4        # f32 biases
        + Bp * in_dims * 2                         # bf16 state in
        + Bp * n_pad * 4                           # f32 logits out
    )

    out = pl.pallas_call(
        _actor_mlp_kernel,
        out_shape=jax.ShapeDtypeStruct((Bp, n_pad), jnp.float32),
        grid_spec=pltpu.PrefetchScalarGridSpec(
            num_scalar_prefetch=0,
            grid=grid,
            in_specs=[
                pl.BlockSpec((tb, in_dims), lambda i: (i, 0)),
                resident(w1), resident(b1),
                resident(w2), resident(b2),
                resident(w3), resident(b3),
            ],
            out_specs=pl.BlockSpec((tb, n_pad), lambda i: (i, 0)),
        ),
        compiler_params=pltpu.CompilerParams(
            dimension_semantics=("parallel",),
        ),
        cost_estimate=pl.CostEstimate(
            flops=flops, transcendentals=0, bytes_accessed=bytes_accessed
        ),
    )(x, w1, b1, w2, b2, w3, b3)

    return out[:B, :n_actions]


def init_params(key, input_dims, n_actions, fc1_dims=256, fc2_dims=256):
    """Deterministic init mirroring nn.Linear default (uniform +/- 1/sqrt(fan_in)).

    Weights are stored transposed vs. torch, i.e. (in_features, out_features) so each
    layer is y = x @ W + b, and are kept in bfloat16 (MXU-native). Biases stay f32.
    The pi layer is zero-padded to a 128-wide lane dimension for a lane-dense store.
    """
    def linear(k, fan_in, fan_out):
        kw, kb = jax.random.split(k)
        bound = 1.0 / jnp.sqrt(fan_in)
        w = jax.random.uniform(kw, (fan_in, fan_out), jnp.float32, -bound, bound)
        b = jax.random.uniform(kb, (1, fan_out), jnp.float32, -bound, bound)
        return w, b

    k1, k2, k3 = jax.random.split(key, 3)
    w1, b1 = linear(k1, input_dims, fc1_dims)
    w2, b2 = linear(k2, fc1_dims, fc2_dims)
    w3, b3 = linear(k3, fc2_dims, n_actions)

    n_pad = _round_up(max(n_actions, 128), 128)
    w3 = jnp.pad(w3, ((0, 0), (0, n_pad - n_actions)))   # padded columns are zero
    b3 = jnp.pad(b3, ((0, 0), (0, n_pad - n_actions)))

    return {
        "fc1": (w1.astype(jnp.bfloat16), b1),
        "fc2": (w2.astype(jnp.bfloat16), b2),
        "pi": (w3.astype(jnp.bfloat16), b3),
        "n_actions": n_actions,
    }


def _reference(state, params):
    """Pure-JAX reference with the same bf16 operand / f32 accumulation scheme."""
    w1, b1 = params["fc1"]
    w2, b2 = params["fc2"]
    w3, b3 = params["pi"]
    n = params["n_actions"]
    x = state.astype(jnp.bfloat16)
    h1 = jnp.maximum(jnp.dot(x, w1, preferred_element_type=jnp.float32) + b1, 0.0)
    h1 = h1.astype(jnp.bfloat16)
    h2 = jnp.maximum(jnp.dot(h1, w2, preferred_element_type=jnp.float32) + b2, 0.0)
    h2 = h2.astype(jnp.bfloat16)
    pi = jnp.dot(h2, w3, preferred_element_type=jnp.float32) + b3
    return pi[:, :n]


if __name__ == "__main__":
    key = jax.random.PRNGKey(0)
    k_params, k_state = jax.random.split(key)

    batch = 8
    input_dims = 32
    n_actions = 8

    params = init_params(k_params, input_dims, n_actions, fc1_dims=256, fc2_dims=256)
    state = jax.random.normal(k_state, (batch, input_dims), jnp.float32)

    pi = actor_forward(state, params)
    pi = jax.block_until_ready(pi)

    ref = _reference(state, params)
    assert pi.shape == (batch, n_actions)
    assert jnp.allclose(pi, ref, atol=1e-3, rtol=1e-3), (
        float(jnp.max(jnp.abs(pi - ref)))
    )

    print("KERNEL_OK")
</pallas_src>

<mosaic_0001>
module attributes {stable_mosaic.version = 11 : i64} {
  func.func @_actor_mlp_kernel(%arg0: i32, %arg1: memref<8x32xbf16, #tpu.memory_space<vmem>>, %arg2: memref<32x256xbf16, #tpu.memory_space<vmem>>, %arg3: memref<1x256xf32, #tpu.memory_space<vmem>>, %arg4: memref<256x256xbf16, #tpu.memory_space<vmem>>, %arg5: memref<1x256xf32, #tpu.memory_space<vmem>>, %arg6: memref<256x128xbf16, #tpu.memory_space<vmem>>, %arg7: memref<1x128xf32, #tpu.memory_space<vmem>>, %arg8: memref<8x128xf32, #tpu.memory_space<vmem>>) attributes {dimension_semantics = [#tpu.dimension_semantics<parallel>], iteration_bounds = array<i64: 1>, scalar_prefetch = 0 : i64, scratch_operands = 0 : i64, tpu.core_type = #tpu.core_type<tc>, window_params = [{transform_indices = @transform_0, window_bounds = array<i64: 8, 32>}, {pipeline_mode = #tpu.pipeline_mode<synchronous>, transform_indices = @transform_1, window_bounds = array<i64: 32, 256>}, {pipeline_mode = #tpu.pipeline_mode<synchronous>, transform_indices = @transform_2, window_bounds = array<i64: 1, 256>}, {pipeline_mode = #tpu.pipeline_mode<synchronous>, transform_indices = @transform_3, window_bounds = array<i64: 256, 256>}, {pipeline_mode = #tpu.pipeline_mode<synchronous>, transform_indices = @transform_4, window_bounds = array<i64: 1, 256>}, {pipeline_mode = #tpu.pipeline_mode<synchronous>, transform_indices = @transform_5, window_bounds = array<i64: 256, 128>}, {pipeline_mode = #tpu.pipeline_mode<synchronous>, transform_indices = @transform_6, window_bounds = array<i64: 1, 128>}, {transform_indices = @transform_7, window_bounds = array<i64: 8, 128>}]} {
    %c0 = arith.constant 0 : index
    %c0_0 = arith.constant 0 : index
    %0 = vector.load %arg1[%c0, %c0_0] : memref<8x32xbf16, #tpu.memory_space<vmem>>, vector<8x32xbf16>
    %c0_1 = arith.constant 0 : index
    %c0_2 = arith.constant 0 : index
    %1 = vector.load %arg2[%c0_1, %c0_2] : memref<32x256xbf16, #tpu.memory_space<vmem>>, vector<32x256xbf16>
    %cst = arith.constant dense<0.000000e+00> : vector<8x256xf32>
    %2 = tpu.matmul %0, %1, %cst {dimension_numbers = #tpu.dot_dimension_numbers<[1], [0], [0], [1], [0, 0, 1, 1], [], []>} : vector<8x32xbf16>, vector<32x256xbf16>, vector<8x256xf32> -> vector<8x256xf32>
    %c0_3 = arith.constant 0 : index
    %c0_4 = arith.constant 0 : index
    %3 = vector.load %arg3[%c0_3, %c0_4] : memref<1x256xf32, #tpu.memory_space<vmem>>, vector<1x256xf32>
    %4 = vector.broadcast %3 : vector<1x256xf32> to vector<8x256xf32>
    %5 = arith.addf %2, %4 : vector<8x256xf32>
    %cst_5 = arith.constant 0.000000e+00 : f32
    %6 = vector.broadcast %cst_5 : f32 to vector<8x256xf32>
    %7 = arith.maximumf %5, %6 : vector<8x256xf32>
    %8 = arith.truncf %7 : vector<8x256xf32> to vector<8x256xbf16>
    %c0_6 = arith.constant 0 : index
    %c0_7 = arith.constant 0 : index
    %9 = vector.load %arg4[%c0_6, %c0_7] : memref<256x256xbf16, #tpu.memory_space<vmem>>, vector<256x256xbf16>
    %cst_8 = arith.constant dense<0.000000e+00> : vector<8x256xf32>
    %10 = tpu.matmul %8, %9, %cst_8 {dimension_numbers = #tpu.dot_dimension_numbers<[1], [0], [0], [1], [0, 0, 1, 1], [], []>} : vector<8x256xbf16>, vector<256x256xbf16>, vector<8x256xf32> -> vector<8x256xf32>
    %c0_9 = arith.constant 0 : index
    %c0_10 = arith.constant 0 : index
    %11 = vector.load %arg5[%c0_9, %c0_10] : memref<1x256xf32, #tpu.memory_space<vmem>>, vector<1x256xf32>
    %12 = vector.broadcast %11 : vector<1x256xf32> to vector<8x256xf32>
    %13 = arith.addf %10, %12 : vector<8x256xf32>
    %cst_11 = arith.constant 0.000000e+00 : f32
    %14 = vector.broadcast %cst_11 : f32 to vector<8x256xf32>
    %15 = arith.maximumf %13, %14 : vector<8x256xf32>
    %16 = arith.truncf %15 : vector<8x256xf32> to vector<8x256xbf16>
    %c0_12 = arith.constant 0 : index
    %c0_13 = arith.constant 0 : index
    %17 = vector.load %arg6[%c0_12, %c0_13] : memref<256x128xbf16, #tpu.memory_space<vmem>>, vector<256x128xbf16>
    %cst_14 = arith.constant dense<0.000000e+00> : vector<8x128xf32>
    %18 = tpu.matmul %16, %17, %cst_14 {dimension_numbers = #tpu.dot_dimension_numbers<[1], [0], [0], [1], [0, 0, 1, 1], [], []>} : vector<8x256xbf16>, vector<256x128xbf16>, vector<8x128xf32> -> vector<8x128xf32>
    %c0_15 = arith.constant 0 : index
    %c0_16 = arith.constant 0 : index
    %19 = vector.load %arg7[%c0_15, %c0_16] : memref<1x128xf32, #tpu.memory_space<vmem>>, vector<1x128xf32>
    %20 = vector.broadcast %19 : vector<1x128xf32> to vector<8x128xf32>
    %21 = arith.addf %18, %20 : vector<8x128xf32>
    %c0_17 = arith.constant 0 : index
    %c0_18 = arith.constant 0 : index
    %22 = vector.load %arg8[%c0_17, %c0_18] : memref<8x128xf32, #tpu.memory_space<vmem>>, vector<8x128xf32>
    tpu.vector_store %arg8[%c0_17, %c0_18], %21 {strides = array<i32>} : memref<8x128xf32, #tpu.memory_space<vmem>>, vector<8x128xf32>,
    return
  }
  func.func @transform_0(%arg0: i32) -> (i32, i32) {
    %c0_i32 = arith.constant 0 : i32
    %c0_i32_0 = arith.constant 0 : i32
    return %arg0, %c0_i32 : i32, i32
  }
  func.func @transform_1(%arg0: i32) -> (i32, i32) {
    %c0_i32 = arith.constant 0 : i32
    %c0_i32_0 = arith.constant 0 : i32
    %c0_i32_1 = arith.constant 0 : i32
    return %c0_i32, %c0_i32_0 : i32, i32
  }
  func.func @transform_2(%arg0: i32) -> (i32, i32) {
    %c0_i32 = arith.constant 0 : i32
    %c0_i32_0 = arith.constant 0 : i32
    %c0_i32_1 = arith.constant 0 : i32
    return %c0_i32, %c0_i32_0 : i32, i32
  }
  func.func @transform_3(%arg0: i32) -> (i32, i32) {
    %c0_i32 = arith.constant 0 : i32
    %c0_i32_0 = arith.constant 0 : i32
    %c0_i32_1 = arith.constant 0 : i32
    return %c0_i32, %c0_i32_0 : i32, i32
  }
  func.func @transform_4(%arg0: i32) -> (i32, i32) {
    %c0_i32 = arith.constant 0 : i32
    %c0_i32_0 = arith.constant 0 : i32
    %c0_i32_1 = arith.constant 0 : i32
    return %c0_i32, %c0_i32_0 : i32, i32
  }
  func.func @transform_5(%arg0: i32) -> (i32, i32) {
    %c0_i32 = arith.constant 0 : i32
    %c0_i32_0 = arith.constant 0 : i32
    %c0_i32_1 = arith.constant 0 : i32
    return %c0_i32, %c0_i32_0 : i32, i32
  }
  func.func @transform_6(%arg0: i32) -> (i32, i32) {
    %c0_i32 = arith.constant 0 : i32
    %c0_i32_0 = arith.constant 0 : i32
    %c0_i32_1 = arith.constant 0 : i32
    return %c0_i32, %c0_i32_0 : i32, i32
  }
  func.func @transform_7(%arg0: i32) -> (i32, i32) {
    %c0_i32 = arith.constant 0 : i32
    %c0_i32_0 = arith.constant 0 : i32
    return %arg0, %c0_i32 : i32, i32
  }
}

</mosaic_0001>

<bundles_post_ra>
// kernel: tpu_custom_call.1
= control target key start
LH: loop header
LB: loop body
LE: loop exit
PB: predicated region body
PF: predicated region fallthrough
CT: control target
= control target key end

     0   :  { %12 = vsyncpa [#allocation3], 0  ;;  %s1008_s0 = inlined_call_operand.hbm [shape: bf16[8,32], index: 0, kind: input, shape index: {}]   ;;  %s1009_s1 = inlined_call_operand.hbm [shape: bf16[32,256], index: 1, kind: input, shape index: {}]   ;;  %s1010_s2 = inlined_call_operand.vmem [shape: f32[1,256], index: 2, kind: input, shape index: {}]   ;;  %s1011_s3 = inlined_call_operand.hbm [shape: bf16[256,256], index: 3, kind: input, shape index: {}]   ;;  %s1012_s4 = inlined_call_operand.vmem [shape: f32[1,256], index: 4, kind: input, shape index: {}]   ;;  %s1013_s5 = inlined_call_operand.hbm [shape: bf16[256,128], index: 5, kind: input, shape index: {}]   ;;  %s1014_s6 = inlined_call_operand.vmem [shape: f32[1,128], index: 6, kind: input, shape index: {}]   ;;  %s1015_s7 = inlined_call_operand.hbm [shape: f32[8,128], index: 7, kind: output, shape index: {}]  }
   0x1   :  { %13 = vsyncpa [#allocation6], 0 }
   0x2   :  { %14 = vsyncpa [#allocation9], 0 }
   0x3   :  { %15 = vsyncpa [#allocation4], 0  ;;  %s883_s24 = smov [#allocation5]   ;;  %s765_s28 = scalar_lea.hbm %s1009_s1, 512 }
   0x4   :  { %s31_s25 = sshll.u32 %s883_s24, 4  ;;  %p766_p0 = scmp.ne.s32.totalorder %s1009_s1, %s765_s28  ;;  %s32_s25 = int_to_ptr.vmem [resolvable:$true] %s31_s25 }
   0x5   :  { %p769_p1 = scmp.lt.u32.totalorder %s765_s28, %s1009_s1 }
   0x7   :  { %p771_p2 = pnand %p769_p1, %p766_p0 }
   0x9   :  { %774 = shalt.err (!%p771_p2)
}
   0xa   :  { %s775_s10 = scalar_lea.vmem %s32_s25, 512  ;;  %p780_p4 = scmp.lt.s32.totalorder %s32_s25, %s32_s25 }
   0xb   :  { %p776_p3 = scmp.ne.s32.totalorder %s32_s25, %s775_s10  ;;  %p781_p5 = scmp.lt.s32.totalorder %s775_s10, %s775_s10 }
   0xd   :  { %p782_p6 = por %p781_p5, %p780_p4 }
   0xf   :  { %p783_p7 = pnand %p782_p6, %p776_p3 }
  0x11   :  { %786 = shalt.err (!%p783_p7)
}
  0x12   :  { %s884_s11 = smov 128   ;;  %s885_s12 = smov 8  }
  0x13   :  { %37 = dma.hbm_to_vmem [thread:$0]  %s1009_s1, 512, %s32_s25, [#allocation6], %s884_s11, %s884_s11, %s885_s12  }
  0x14   :  { %s886_s15 = smov [#allocation2]   ;;  %s887_s17 = smov [#allocation7]  }
  0x15   :  { %s22_s16 = sshll.u32 %s886_s15, 4  ;;  %s45_s18 = sshll.u32 %s887_s17, 4  ;;  %s23_s16 = int_to_ptr.vmem [resolvable:$true] %s22_s16  ;;  %s46_s18 = int_to_ptr.vmem [resolvable:$true] %s45_s18 }
  0x16   :  { %s787_s21 = scalar_lea.hbm %s1008_s0, 64 }
  0x17   :  { %p788_p8 = scmp.ne.s32.totalorder %s1008_s0, %s787_s21  ;;  %p791_p9 = scmp.lt.u32.totalorder %s787_s21, %s1008_s0 }
  0x19   :  { %p793_p10 = pnand %p791_p9, %p788_p8 }
  0x1b   :  { %796 = shalt.err (!%p793_p10)
}
  0x1c   :  { %s797_s1 = scalar_lea.vmem %s23_s16, 64  ;;  %p802_p12 = scmp.lt.s32.totalorder %s23_s16, %s23_s16 }
  0x1d   :  { %p798_p11 = scmp.ne.s32.totalorder %s23_s16, %s797_s1  ;;  %p803_p13 = scmp.lt.s32.totalorder %s797_s1, %s797_s1 }
  0x1f   :  { %p804_p0 = por %p803_p13, %p802_p12 }
  0x21   :  { %p805_p1 = pnand %p804_p0, %p798_p11 }
  0x23   :  { %808 = shalt.err (!%p805_p1)
}
  0x24   :  { %25 = dma.hbm_to_vmem [thread:$0]  %s1008_s0, 64, %s23_s16, [#allocation3]  }
  0x25   :  { %s809_s30 = scalar_lea.hbm %s1011_s3, 4096 }
  0x26   :  { %p810_p2 = scmp.ne.s32.totalorder %s1011_s3, %s809_s30  ;;  %p813_p3 = scmp.lt.u32.totalorder %s809_s30, %s1011_s3 }
  0x28   :  { %p815_p4 = pnand %p813_p3, %p810_p2 }
  0x2a   :  { %818 = shalt.err (!%p815_p4)
}
  0x2b   :  { %s819_s14 = scalar_lea.vmem %s46_s18, 4096  ;;  %p824_p6 = scmp.lt.s32.totalorder %s46_s18, %s46_s18 }
  0x2c   :  { %p820_p5 = scmp.ne.s32.totalorder %s46_s18, %s819_s14  ;;  %p825_p7 = scmp.lt.s32.totalorder %s819_s14, %s819_s14 }
  0x2e   :  { %p826_p8 = por %p825_p7, %p824_p6 }
  0x30   :  { %p827_p9 = pnand %p826_p8, %p820_p5 }
  0x32   :  { %830 = shalt.err (!%p827_p9)
}
  0x33   :  { %51 = dma.hbm_to_vmem [thread:$0]  %s1011_s3, 4096, %s46_s18, [#allocation6], %s884_s11, %s884_s11, %s885_s12  }
  0x34   :  { %s888_s16 = smov [#allocation8]   ;;  %s831_s21 = scalar_lea.hbm %s1013_s5, 2048 }
  0x35   :  { %s59_s17 = sshll.u32 %s888_s16, 4  ;;  %p832_p10 = scmp.ne.s32.totalorder %s1013_s5, %s831_s21  ;;  %s60_s17 = int_to_ptr.vmem [resolvable:$true] %s59_s17 }
  0x36   :  { %p835_p11 = scmp.lt.u32.totalorder %s831_s21, %s1013_s5 }
  0x38   :  { %p837_p12 = pnand %p835_p11, %p832_p10 }
  0x3a   :  { %840 = shalt.err (!%p837_p12)
}
  0x3b   :  { %s841_s1 = scalar_lea.vmem %s60_s17, 2048  ;;  %p846_p0 = scmp.lt.s32.totalorder %s60_s17, %s60_s17 }
  0x3c   :  { %p842_p13 = scmp.ne.s32.totalorder %s60_s17, %s841_s1  ;;  %p847_p1 = scmp.lt.s32.totalorder %s841_s1, %s841_s1 }
  0x3e   :  { %p848_p2 = por %p847_p1, %p846_p0 }
  0x40   :  { %p849_p3 = pnand %p848_p2, %p842_p13 }
  0x42   :  { %852 = shalt.err (!%p849_p3)
}
  0x43   :  { %s889_s3 = smov 64   ;;  %s890_s11 = smov 4  }
  0x44   :  { %65 = dma.hbm_to_vmem [thread:$0]  %s1013_s5, 2048, %s60_s17, [#allocation9], %s889_s3, %s889_s3, %s890_s11  }
  0x45   :  { %875 = dma.done.wait [#allocation3], 64  }
  0x46   :  { %876 = vsyncadd [#allocation3], 4294967232 }
  0x47   :  { %877 = dma.done.wait [#allocation6], 4608  }
  0x48   :  { %878 = vsyncadd [#allocation6], 4294962688 }
  0x49   :  { %879 = dma.done.wait [#allocation9], 2048  }
  0x4a   :  { %880 = vsyncadd [#allocation9], 4294965248  ;;  %v891_v0 = vmov 0   ;;  %v695_v1 = vld [vmem:[#allocation5 + $0x4] ss:$8 sps:$4 sm:$0xff]   ;;  %vm118_vm0 = vcmask 261120   ;;  %v88_v50 = vlaneseq }
  0x4b   :  { %154 = vmatprep.mubr.bf16.mxu0 %v891_v0  ;;  %v697_v2 = vld [vmem:[#allocation5] ss:$8 sps:$4 sm:$0xff]   ;;  %122 = vmatprep.subr.bf16.mxu0 %v695_v1  ;;  %v698_v3 = vld [vmem:[#allocation5 + $0x14] ss:$8 sps:$4 sm:$0xff]   ;;  %v700_v4 = vld [vmem:[#allocation5 + $0x10] ss:$8 sps:$4 sm:$0xff]  }
  0x4c   :  { %123 = vmatpush1.bf16.msra.mxu0 %v697_v2  ;;  %v701_v5 = vld [vmem:[#allocation7 + $0x4] ss:$8 sps:$4 sm:$0xff]   ;;  %v703_v6 = vld [vmem:[#allocation7] ss:$8 sps:$4 sm:$0xff]   ;;  %v704_v7 = vld [vmem:[#allocation7 + $0x14] ss:$8 sps:$4 sm:$0xff]  }
  0x4d   :  { %124 = vmatprep.subr.bf16.mxu0 %v698_v3  ;;  %371 = vmatprep.subr.bf16.mxu1 %v701_v5  ;;  %v81_v8 = vld [vmem:[#allocation2] sm:$0xf]  ;;  %v706_v9 = vld [vmem:[#allocation7 + $0x10] ss:$8 sps:$4 sm:$0xff]   ;;  %v707_v10 = vld [vmem:[#allocation7 + $0x24] ss:$8 sps:$4 sm:$0xff]  }
  0x4e   :  { %372 = vmatpush1.bf16.msra.mxu1 %v703_v6  ;;  %v709_v11 = vld [vmem:[#allocation7 + $0x20] ss:$8 sps:$4 sm:$0xff]   ;;  %v710_v12 = vld [vmem:[#allocation7 + $0x34] ss:$8 sps:$4 sm:$0xff]   ;;  %v712_v13 = vld [vmem:[#allocation7 + $0x30] ss:$8 sps:$4 sm:$0xff]  }
  0x4f   :  { %373 = vmatprep.subr.bf16.mxu1 %v704_v7  ;;  %v713_v14 = vld [vmem:[#allocation7 + $0x44] ss:$8 sps:$4 sm:$0xff]   ;;  %v715_v15 = vld [vmem:[#allocation7 + $0x40] ss:$8 sps:$4 sm:$0xff]   ;;  %v716_v16 = vld [vmem:[#allocation7 + $0x54] ss:$8 sps:$4 sm:$0xff]  }
  0x50   :  { %125 = vmatpush1.bf16.msra.mxu0 %v700_v4  ;;  %v718_v17 = vld [vmem:[#allocation7 + $0x50] ss:$8 sps:$4 sm:$0xff]   ;;  %v719_v18 = vld [vmem:[#allocation7 + $0x64] ss:$8 sps:$4 sm:$0xff]   ;;  %v721_v19 = vld [vmem:[#allocation7 + $0x60] ss:$8 sps:$4 sm:$0xff]  }
  0x51   :  { %v722_v20 = vld [vmem:[#allocation7 + $0x74] ss:$8 sps:$4 sm:$0xff]   ;;  %v724_v21 = vld [vmem:[#allocation7 + $0x70] ss:$8 sps:$4 sm:$0xff]   ;;  %v725_v22 = vld [vmem:[#allocation7 + $0x84] ss:$8 sps:$4 sm:$0xff]  }
  0x52   :  { %374 = vmatpush1.bf16.msra.mxu1 %v706_v9  ;;  %v727_v23 = vld [vmem:[#allocation7 + $0x80] ss:$8 sps:$4 sm:$0xff]   ;;  %v728_v24 = vld [vmem:[#allocation7 + $0x94] ss:$8 sps:$4 sm:$0xff]   ;;  %v730_v25 = vld [vmem:[#allocation7 + $0x90] ss:$8 sps:$4 sm:$0xff]  }
  0x53   :  { %613 = vmatmul.mubr.msk.bf16.vlgmr.msra.gmra.mrb[0].mxu0 %vm118_vm0, %v81_v8  ;;  %375 = vmatprep.subr.bf16.mxu1 %v707_v10  ;;  %v731_v26 = vld [vmem:[#allocation7 + $0xa4] ss:$8 sps:$4 sm:$0xff]   ;;  %v733_v27 = vld [vmem:[#allocation7 + $0xa0] ss:$8 sps:$4 sm:$0xff]   ;;  %v734_v28 = vld [vmem:[#allocation7 + $0xb4] ss:$8 sps:$4 sm:$0xff]  }
  0x54   :  { %v736_v29 = vld [vmem:[#allocation7 + $0xb0] ss:$8 sps:$4 sm:$0xff]   ;;  %v737_v30 = vld [vmem:[#allocation7 + $0xc4] ss:$8 sps:$4 sm:$0xff]   ;;  %v739_v31 = vld [vmem:[#allocation7 + $0xc0] ss:$8 sps:$4 sm:$0xff]  }
  0x55   :  { %v740_v32 = vld [vmem:[#allocation7 + $0xd4] ss:$8 sps:$4 sm:$0xff]   ;;  %v742_v33 = vld [vmem:[#allocation7 + $0xd0] ss:$8 sps:$4 sm:$0xff]   ;;  %v743_v34 = vld [vmem:[#allocation7 + $0xe4] ss:$8 sps:$4 sm:$0xff]  }
  0x56   :  { %376 = vmatpush1.bf16.msra.mxu1 %v709_v11  ;;  %v745_v35 = vld [vmem:[#allocation7 + $0xe0] ss:$8 sps:$4 sm:$0xff]   ;;  %v746_v36 = vld [vmem:[#allocation7 + $0xf4] ss:$8 sps:$4 sm:$0xff]   ;;  %v748_v37 = vld [vmem:[#allocation7 + $0xf0] ss:$8 sps:$4 sm:$0xff]  }
  0x57   :  { %377 = vmatprep.subr.bf16.mxu1 %v710_v12  ;;  %v749_v38 = vld [vmem:[#allocation8 + $0x40] sm:$0xff]   ;;  %v751_v40 = vld [vmem:[#allocation8 + $0x48] sm:$0xff]   ;;  %v753_v42 = vld [vmem:[#allocation8 + $0x50] sm:$0xff]   ;;  %v89_v51 = vshrl.u32 %v88_v50, 7 }
  0x58   :  { %v750_v39 = vld [vmem:[#allocation8] sm:$0xff]   ;;  %663 = vmatprep.subr.bf16.mxu0 %v749_v38  ;;  %v752_v41 = vld [vmem:[#allocation8 + $0x8] sm:$0xff]   ;;  %v754_v43 = vld [vmem:[#allocation8 + $0x10] sm:$0xff]  }
  0x59   :  { %664 = vmatpush3.bf16.msra.mxu0 %v750_v39  ;;  %v755_v44 = vld [vmem:[#allocation8 + $0x58] sm:$0xff]   ;;  %v757_v46 = vld [vmem:[#allocation8 + $0x60] sm:$0xff]   ;;  %v759_v48 = vld [vmem:[#allocation8 + $0x68] sm:$0xff]   ;;  %v90_v52 = vsub.s32 0, %v89_v51  ;;  %v94_v54 = vsub.s32 1, %v89_v51 }
  0x5a   :  { %378 = vmatpush1.bf16.msra.mxu1 %v712_v13  ;;  %665 = vmatprep.subr.bf16.mxu0 %v751_v40  ;;  %v756_v45 = vld [vmem:[#allocation8 + $0x18] sm:$0xff]   ;;  %v758_v47 = vld [vmem:[#allocation8 + $0x20] sm:$0xff]   ;;  %v760_v49 = vld [vmem:[#allocation8 + $0x28] sm:$0xff]  }
  0x5b   :  { %379 = vmatprep.subr.bf16.mxu1 %v713_v14  ;;  %v86_v53 = vld [vmem:[%s1010_s2] sm:$0x3]  ;;  %v761_v3 = vld [vmem:[#allocation8 + $0x70] sm:$0xff]  }
  0x5c   :  { %v91_v55 = vrot.slane %v86_v53, %v90_v52  ;;  %v95_v56 = vrot.slane %v86_v53, %v94_v54  ;;  %v762_v4 = vld [vmem:[#allocation8 + $0x30] sm:$0xff]   ;;  %v763_v5 = vld [vmem:[#allocation8 + $0x78] sm:$0xff]  }
  0x5d   :  { %666 = vmatpush3.bf16.msra.mxu0 %v752_v41  ;;  %v764_v6 = vld [vmem:[#allocation8 + $0x38] sm:$0xff]  }
  0x5e   :  { %380 = vmatpush1.bf16.msra.mxu1 %v715_v15  ;;  %667 = vmatprep.subr.bf16.mxu0 %v753_v42  ;;  %v199_v7 = vld [vmem:[%s1012_s4] sm:$0x3]  ;;  %s892_s4 = smov [#allocation10]  }
  0x5f   :  { %381 = vmatprep.subr.bf16.mxu1 %v716_v16  ;;  %v204_v8 = vrot.slane %v199_v7, %v90_v52  ;;  %v208_v9 = vrot.slane %v199_v7, %v94_v54  ;;  %s598_s30 = sshll.u32 %s892_s4, 4  ;;  %s599_s30 = int_to_ptr.vmem [resolvable:$true] %s598_s30 }
  0x60   :  { %s853_s8 = scalar_lea.vmem %s599_s30, 128  ;;  %p858_p5 = scmp.lt.s32.totalorder %s599_s30, %s599_s30 }
  0x61   :  { %668 = vmatpush3.bf16.msra.mxu0 %v754_v43  ;;  %p854_p4 = scmp.ne.s32.totalorder %s599_s30, %s853_s8  ;;  %p859_p6 = scmp.lt.s32.totalorder %s853_s8, %s853_s8 }
  0x62   :  { %382 = vmatpush1.bf16.msra.mxu1 %v718_v17  ;;  %669 = vmatprep.subr.bf16.mxu0 %v755_v44 }
  0x63   :  { %383 = vmatprep.subr.bf16.mxu1 %v719_v18  ;;  %p860_p7 = por %p859_p6, %p858_p5 }
  0x65   :  { %670 = vmatpush3.bf16.msra.mxu0 %v756_v45  ;;  %p861_p8 = pnand %p860_p7, %p854_p4 }
  0x66   :  { %384 = vmatpush1.bf16.msra.mxu1 %v721_v19  ;;  %671 = vmatprep.subr.bf16.mxu0 %v757_v46 }
  0x67   :  { %385 = vmatprep.subr.bf16.mxu1 %v722_v20 }
  0x69   :  { %672 = vmatpush3.bf16.msra.mxu0 %v758_v47 }
  0x6a   :  { %386 = vmatpush1.bf16.msra.mxu1 %v724_v21  ;;  %673 = vmatprep.subr.bf16.mxu0 %v759_v48  ;;  %v646_v21 = vld [vmem:[%s1014_s6] ss:$0 sm:$0xff] }
  0x6b   :  { %387 = vmatprep.subr.bf16.mxu1 %v725_v22 }
  0x6d   :  { %674 = vmatpush3.bf16.msra.mxu0 %v760_v49 }
  0x6e   :  { %388 = vmatpush1.bf16.msra.mxu1 %v727_v23  ;;  %675 = vmatprep.subr.bf16.mxu0 %v761_v3 }
  0x6f   :  { %389 = vmatprep.subr.bf16.mxu1 %v728_v24 }
  0x71   :  { %676 = vmatpush3.bf16.msra.mxu0 %v762_v4 }
  0x72   :  { %390 = vmatpush1.bf16.msra.mxu1 %v730_v25  ;;  %677 = vmatprep.subr.bf16.mxu0 %v763_v5 }
  0x73   :  { %391 = vmatprep.subr.bf16.mxu1 %v731_v26 }
  0x75   :  { %678 = vmatpush3.bf16.msra.mxu0 %v764_v6 }
  0x76   :  { %392 = vmatpush1.bf16.msra.mxu1 %v733_v27 }
  0x77   :  { %393 = vmatprep.subr.bf16.mxu1 %v734_v28 }
  0x7a   :  { %394 = vmatpush1.bf16.msra.mxu1 %v736_v29 }
  0x7b   :  { %395 = vmatprep.subr.bf16.mxu1 %v737_v30 }
  0x7e   :  { %396 = vmatpush1.bf16.msra.mxu1 %v739_v31 }
  0x7f   :  { %397 = vmatprep.subr.bf16.mxu1 %v740_v32 }
  0x82   :  { %398 = vmatpush1.bf16.msra.mxu1 %v742_v33 }
  0x83   :  { %399 = vmatprep.subr.bf16.mxu1 %v743_v34 }
  0x86   :  { %400 = vmatpush1.bf16.msra.mxu1 %v745_v35 }
  0x87   :  { %401 = vmatprep.subr.bf16.mxu1 %v746_v36 }
  0x8a   :  { %402 = vmatpush1.bf16.msra.mxu1 %v748_v37 }
 0x126   :  { %v156_v57 = vpop.f32.mrb[0].mxu0 }
 0x127   :  { %v157_v58 = vadd.f32 %v156_v57, %v91_v55  ;;  %v158_v59 = vpop.f32.mrb[1].mxu0 }
 0x128   :  { %v159_v60 = vadd.f32 %v158_v59, %v95_v56  ;;  %v160_v61 = vpop.f32.mrb[2].mxu0 }
 0x129   :  { %v163_v62 = vmax.f32 %v157_v58, 0.0  ;;  %v161_v63 = vpop.f32.mrb[3].mxu0 }
 0x12a   :  { %v164_v0 = vmax.f32 %v159_v60, 0.0 }
 0x12b   :  { %v165_v2 = vpack.c.bf16 %v163_v62, %v163_v62 }
 0x12c   :  { %v166_v1 = vpack.c.bf16 %v164_v0, %v164_v0 }
 0x12e   :  { %403 = vmatprep.mubr.bf16.mxu1 %v166_v1 }
 0x12f   :  { %404 = vmatmul.mubr.bf16.vlgmr.msra.gmra.mrb[0].mxu1 %v165_v2 }
 0x202   :  { %v405_v10 = vpop.f32.mrb[0].mxu1 }
 0x203   :  { %v406_v11 = vadd.f32 %v405_v10, %v204_v8  ;;  %v407_v12 = vpop.f32.mrb[1].mxu1 }
 0x204   :  { %v408_v13 = vadd.f32 %v407_v12, %v208_v9  ;;  %v409_v14 = vpop.f32.mrb[2].mxu1 }
 0x205   :  { %v412_v15 = vmax.f32 %v406_v11, 0.0  ;;  %v410_v16 = vpop.f32.mrb[3].mxu1 }
 0x206   :  { %v413_v17 = vmax.f32 %v408_v13, 0.0 }
 0x207   :  { %v414_v19 = vpack.c.bf16 %v412_v15, %v412_v15 }
 0x208   :  { %v415_v18 = vpack.c.bf16 %v413_v17, %v413_v17 }
 0x20a   :  { %583 = vmatprep.mubr.bf16.mxu0 %v415_v18 }
 0x20b   :  { %584 = vmatmul.mubr.bf16.vlgmr.msra.gmra.mrb[4].mxu0 %v414_v19 }
 0x2de   :  { %v679_v20 = vpop.f32.mrb[4].mxu0 }
 0x2df   :  { %v680_v22 = vpop.f32.mrb[5].mxu0 }
 0x2e0   :  { %v681_v23 = vadd.f32 %v680_v22, %v679_v20  ;;  %v682_v24 = vpop.f32.mrb[6].mxu0 }
 0x2e1   :  { %v683_v25 = vpop.f32.mrb[7].mxu0 }
 0x2e2   :  { %v586_v26 = vadd.f32 %v681_v23, %v646_v21 }
 0x2e4   :  { %591 = vst [vmem:[#allocation10] sm:$0xff] %v586_v26 }
 0x2e5   :  { %864 = shalt.err (!%p861_p8)
}
 0x2e6   :  { %s865_s6 = scalar_lea.hbm %s1015_s7, 128 }
 0x2e7   :  { %p866_p9 = scmp.ne.s32.totalorder %s1015_s7, %s865_s6  ;;  %p869_p10 = scmp.lt.u32.totalorder %s865_s6, %s1015_s7 }
 0x2e9   :  { %p871_p11 = pnand %p869_p10, %p866_p9 }
 0x2eb   :  { %874 = shalt.err (!%p871_p11)
}
 0x2ec   :  { %601 = dma.vmem_to_hbm [thread:$0]  %s599_s30, 128, %s1015_s7, [#allocation4]  }
 0x2ed   :  { %881 = dma.done.wait [#allocation4], 128  }
 0x2ee   :  { %882 = vsyncadd [#allocation4], 4294967168 }
 0x2ef   :  { %605 = vsyncpa [#allocation3], 1 }
 0x2f0   :  { %606 = vsyncpa [#allocation6], 1 }
 0x2f1   :  { %607 = vsyncpa [#allocation9], 1 }
 0x2f2   :  { %608 = vsyncpa [#allocation4], 1 }

</bundles_post_ra>
